<compile_context>
chip_gen: v7x
topology: tpu7x:2x2x1
jax: 0.10.0
libtpu: 0.0.40
codegen_flags: <defaults>
</compile_context>

<pallas_src>
import jax
import jax.numpy as jnp
from jax.experimental import pallas as pl
from jax.experimental.pallas import tpu as pltpu


def _identity_copy_kernel(x_ref, o_ref):
    # Pure tile copy: one VMEM load, one VMEM store. Keep zero extra VPU work
    # so the kernel stays purely HBM-bandwidth bound (vld/vst + DMA limited).
    o_ref[...] = x_ref[...]


def _sublane_multiple(dtype) -> int:
    # Packed sublane granularity: 8 rows for 32-bit, 16 for 16-bit, 32 for 8-bit.
    itemsize = jnp.dtype(dtype).itemsize
    return max(8, 32 // max(1, itemsize))


def pallas_identity_copy(data: jax.Array) -> jax.Array:
    """Optional explicit on-device copy via a tiled Pallas kernel.

    Not used by NullEmbedder's forward (which is a no-op); provided for when a
    materialized copy of the input is explicitly required.
    """
    orig_shape = data.shape

    # Flatten to a 2D (rows, cols) view with the last axis lane-dense.
    if data.ndim == 0:
        flat = data.reshape(1, 1)
    elif data.ndim == 1:
        flat = data.reshape(1, -1)
    else:
        flat = data.reshape(-1, data.shape[-1])

    R, C = flat.shape
    itemsize = jnp.dtype(flat.dtype).itemsize
    sub = _sublane_multiple(flat.dtype)

    # Lane tile: take the full C as one lane-dense block when it is modest
    # (legal even if C is not a multiple of 128, since it equals the full dim);
    # otherwise use a large multiple of 128.
    LANE_TARGET = 2048
    tc = C if C <= LANE_TARGET else (LANE_TARGET // 128) * 128

    # Row tile: as large as possible while keeping a single block <= ~4 MiB
    # (double-buffered input + output => <= ~16 MiB VMEM, safe on v7x's 64 MiB
    # and trivially on v5e/v6e's 128 MiB). Rounded to the dtype sublane
    # multiple; ragged edges are masked by the cdiv grid — no padding needed.
    MAX_BLOCK_BYTES = 4 * 1024 * 1024
    max_rows = max(sub, MAX_BLOCK_BYTES // max(1, tc * itemsize))
    tr = R if R <= max_rows else max(sub, (max_rows // sub) * sub)

    grid = (pl.cdiv(R, tr), pl.cdiv(C, tc))

    out = pl.pallas_call(
        _identity_copy_kernel,
        out_shape=jax.ShapeDtypeStruct((R, C), flat.dtype),
        grid_spec=pltpu.PrefetchScalarGridSpec(
            num_scalar_prefetch=0,
            grid=grid,
            in_specs=[pl.BlockSpec((tr, tc), lambda i, j: (i, j))],
            out_specs=pl.BlockSpec((tr, tc), lambda i, j: (i, j)),
        ),
        compiler_params=pltpu.CompilerParams(
            dimension_semantics=("parallel", "parallel"),
        ),
    )(flat)

    return out.reshape(orig_shape)


def null_embedder_forward(data: jax.Array) -> jax.Array:
    # NullEmbedder does zero work: return the input untouched (no pallas_call,
    # no HBM read/write, no launch overhead). This is the dominant optimization
    # on v5e / v6e / v7x alike.
    return data


class NullEmbedder:
    """JAX equivalent of the PyTorch NullEmbedder (no parameters, identity)."""

    def __init__(self, **kwargs):
        pass

    def __call__(self, data):
        return null_embedder_forward(data)


if __name__ == "__main__":
    key = jax.random.PRNGKey(0)
    # Example input consistent with a video embedder call site: NCHW tensor.
    x = jax.random.normal(key, (2, 4, 16, 16), dtype=jnp.float32)

    embedder = NullEmbedder()
    y = embedder(x)
    y = jax.block_until_ready(y)
    assert y.shape == x.shape and y.dtype == x.dtype
    assert (y is x) or bool(jnp.all(y == x))

    # Exercise the optional Pallas identity-copy kernel once to validate it
    # compiles and runs on TPU and preserves values exactly.
    y2 = jax.block_until_ready(pallas_identity_copy(x))
    assert y2.shape == x.shape and y2.dtype == x.dtype
    assert bool(jnp.all(y2 == x))

    print("KERNEL_OK")
</pallas_src>

<mosaic_0001>
module attributes {stable_mosaic.version = 11 : i64} {
  func.func @_identity_copy_kernel(%arg0: i32, %arg1: i32, %arg2: memref<128x16xf32, #tpu.memory_space<vmem>>, %arg3: memref<128x16xf32, #tpu.memory_space<vmem>>) attributes {dimension_semantics = [#tpu.dimension_semantics<parallel>, #tpu.dimension_semantics<parallel>], iteration_bounds = array<i64: 1, 1>, scalar_prefetch = 0 : i64, scratch_operands = 0 : i64, tpu.core_type = #tpu.core_type<tc>, window_params = [{transform_indices = @transform_0, window_bounds = array<i64: 128, 16>}, {transform_indices = @transform_1, window_bounds = array<i64: 128, 16>}]} {
    %c0 = arith.constant 0 : index
    %c0_0 = arith.constant 0 : index
    %0 = vector.load %arg2[%c0, %c0_0] : memref<128x16xf32, #tpu.memory_space<vmem>>, vector<128x16xf32>
    %c0_1 = arith.constant 0 : index
    %c0_2 = arith.constant 0 : index
    %1 = vector.load %arg3[%c0_1, %c0_2] : memref<128x16xf32, #tpu.memory_space<vmem>>, vector<128x16xf32>
    tpu.vector_store %arg3[%c0_1, %c0_2], %0 {strides = array<i32>} : memref<128x16xf32, #tpu.memory_space<vmem>>, vector<128x16xf32>,
    return
  }
  func.func @transform_0(%arg0: i32, %arg1: i32) -> (i32, i32) {
    %c0_i32 = arith.constant 0 : i32
    return %arg0, %arg1 : i32, i32
  }
  func.func @transform_1(%arg0: i32, %arg1: i32) -> (i32, i32) {
    %c0_i32 = arith.constant 0 : i32
    return %arg0, %arg1 : i32, i32
  }
}

</mosaic_0001>

<bundles_post_ra>
// kernel: tpu_custom_call.1
= control target key start
LH: loop header
LB: loop body
LE: loop exit
PB: predicated region body
PF: predicated region fallthrough
CT: control target
= control target key end

     0   :  { %vm24_vm0 = vcmask 130048   ;;  %s167_s0 = inlined_call_operand.vmem [shape: f32[128,16], index: 0, kind: input, shape index: {}]   ;;  %s168_s1 = inlined_call_operand.vmem [shape: f32[128,16], index: 1, kind: output, shape index: {}]  }
   0x1   :  { %v8_v0 = vld [vmem:[%s167_s0] sm:$0xff]  ;;  %v9_v1 = vld [vmem:[%s167_s0 + $0x8] sm:$0xff]  ;;  %v10_v2 = vld [vmem:[%s167_s0 + $0x10] sm:$0xff] }
   0x2   :  { %25 = vst.msk [vmem:[%s168_s1] sm:$0xff] %vm24_vm0, %v8_v0  ;;  %26 = vst.msk [vmem:[%s168_s1 + $0x8] sm:$0xff] %vm24_vm0, %v9_v1  ;;  %v11_v3 = vld [vmem:[%s167_s0 + $0x18] sm:$0xff]  ;;  %v12_v4 = vld [vmem:[%s167_s0 + $0x20] sm:$0xff] }
   0x3   :  { %27 = vst.msk [vmem:[%s168_s1 + $0x10] sm:$0xff] %vm24_vm0, %v10_v2  ;;  %v13_v5 = vld [vmem:[%s167_s0 + $0x28] sm:$0xff]  ;;  %28 = vst.msk [vmem:[%s168_s1 + $0x18] sm:$0xff] %vm24_vm0, %v11_v3  ;;  %v14_v6 = vld [vmem:[%s167_s0 + $0x30] sm:$0xff] }
   0x4   :  { %29 = vst.msk [vmem:[%s168_s1 + $0x20] sm:$0xff] %vm24_vm0, %v12_v4  ;;  %30 = vst.msk [vmem:[%s168_s1 + $0x28] sm:$0xff] %vm24_vm0, %v13_v5  ;;  %v15_v7 = vld [vmem:[%s167_s0 + $0x38] sm:$0xff]  ;;  %v16_v8 = vld [vmem:[%s167_s0 + $0x40] sm:$0xff] }
   0x5   :  { %31 = vst.msk [vmem:[%s168_s1 + $0x30] sm:$0xff] %vm24_vm0, %v14_v6  ;;  %32 = vst.msk [vmem:[%s168_s1 + $0x38] sm:$0xff] %vm24_vm0, %v15_v7  ;;  %v17_v9 = vld [vmem:[%s167_s0 + $0x48] sm:$0xff]  ;;  %v18_v10 = vld [vmem:[%s167_s0 + $0x50] sm:$0xff] }
   0x6   :  { %33 = vst.msk [vmem:[%s168_s1 + $0x40] sm:$0xff] %vm24_vm0, %v16_v8  ;;  %v19_v11 = vld [vmem:[%s167_s0 + $0x58] sm:$0xff]  ;;  %34 = vst.msk [vmem:[%s168_s1 + $0x48] sm:$0xff] %vm24_vm0, %v17_v9  ;;  %v20_v12 = vld [vmem:[%s167_s0 + $0x60] sm:$0xff] }
   0x7   :  { %35 = vst.msk [vmem:[%s168_s1 + $0x50] sm:$0xff] %vm24_vm0, %v18_v10  ;;  %36 = vst.msk [vmem:[%s168_s1 + $0x58] sm:$0xff] %vm24_vm0, %v19_v11  ;;  %v21_v13 = vld [vmem:[%s167_s0 + $0x68] sm:$0xff]  ;;  %v22_v14 = vld [vmem:[%s167_s0 + $0x70] sm:$0xff] }
   0x8   :  { %37 = vst.msk [vmem:[%s168_s1 + $0x60] sm:$0xff] %vm24_vm0, %v20_v12  ;;  %38 = vst.msk [vmem:[%s168_s1 + $0x68] sm:$0xff] %vm24_vm0, %v21_v13  ;;  %v23_v15 = vld [vmem:[%s167_s0 + $0x78] sm:$0xff] }
   0x9   :  { %39 = vst.msk [vmem:[%s168_s1 + $0x70] sm:$0xff] %vm24_vm0, %v22_v14  ;;  %40 = vst.msk [vmem:[%s168_s1 + $0x78] sm:$0xff] %vm24_vm0, %v23_v15 }

</bundles_post_ra>
